<compile_context>
chip_gen: v6e
topology: v6e:2x2x1
jax: 0.10.0
libtpu: 0.0.40
codegen_flags: <defaults>
</compile_context>

<pallas_src>
import functools
import math

import jax
import jax.numpy as jnp
from jax import lax
from jax.experimental import pallas as pl
from jax.experimental.pallas import tpu as pltpu


def _gdice_kernel(pred_ref, lab_ref, acc_ref, *, square, num_classes):
    """Grid step (s, n, i).

    pred_ref : (C, S, 128)           prediction slab, native dtype (upcast per class)
    lab_ref  : (S, 128)              integer labels, native dtype
    acc_ref  : (1, 1, C, 3, 8, 128)  f32 accumulators, revisited over i:
               [..., c, 0, :, :] = sum(pred_c * onehot_c)           (numerator)
               [..., c, 1, :, :] = sum(pred_c)  or  sum(pred_c^2)   (denominator, pred term)
               [..., c, 2, :, :] = count(label == c)                (denominator, onehot term)
    """
    i = pl.program_id(2)

    @pl.when(i == 0)
    def _():
        acc_ref[...] = jnp.zeros_like(acc_ref)

    lab = lab_ref[...]                      # (S, 128) -- native int dtype, no upcast
    S = lab.shape[0]
    G8 = S // 8                             # S is a multiple of 8 by construction

    def class_body(c, class_id):
        # One pred plane live at a time; f32 upcast happens here.
        p = pred_ref[c].astype(jnp.float32)               # (S, 128)
        mask = lab == class_id                            # compare in label dtype
        sel = jnp.where(mask, p, 0.0)                     # pred * onehot
        pden = p * p if square else p                     # denominator pred term
        cnt = mask.astype(jnp.float32)                    # onehot (== onehot^2)

        # Vreg-aligned partial reduction to (8,128): pure VPU adds.
        anb_p = sel.reshape(G8, 8, 128).sum(axis=0)
        den_p = pden.reshape(G8, 8, 128).sum(axis=0)
        cnt_p = cnt.reshape(G8, 8, 128).sum(axis=0)

        acc_ref[0, 0, c, 0] += anb_p
        acc_ref[0, 0, c, 1] += den_p
        acc_ref[0, 0, c, 2] += cnt_p

    if num_classes <= 32:
        # Static unroll for small C; Python-int class ids compare in label dtype.
        for c in range(num_classes):
            class_body(c, c)
    else:
        # Dynamic in-kernel loop for large C (bounded live ranges, no code bloat).
        @pl.loop(0, num_classes)
        def _(c):
            class_body(c, c.astype(lab.dtype))


def generalized_dice_loss(pred, label, class_weight, *, square=False,
                          target_step_bytes=4 * 1024 * 1024):
    """pred: (N, C, *spatial) float probabilities; label: (N, *spatial) int class ids;
    class_weight: (C,) float. Returns scalar f32 loss (batch_dice=True path)."""
    N, C = pred.shape[:2]
    spatial = pred.shape[2:]
    assert label.shape == (N,) + tuple(spatial), (label.shape, pred.shape)
    assert class_weight.shape == (C,), class_weight.shape
    L = math.prod(spatial)

    pred_isz = jnp.dtype(pred.dtype).itemsize
    lab_isz = jnp.dtype(label.dtype).itemsize

    # ---- split the spatial rows when N is small so both v7x TensorCores get work
    split = 2 if N < 2 else 1

    # ---- per-generation VMEM budget (v7x: 64 MiB physical, v5e/v6e: 128 MiB) ----
    try:
        phys_vmem = int(pltpu.get_tpu_info().vmem_capacity_bytes)
    except Exception:
        phys_vmem = 64 * 1024 * 1024      # conservative fallback, safe everywhere
    vmem_limit = max(32 * 1024 * 1024,
                     min(96 * 1024 * 1024, (phys_vmem * 7) // 10))

    # ---- tile sizing: ~target_step_bytes of input DMA per grid step, clamped by
    # what actually lives in VMEM (2x double-buffered inputs + in-kernel f32
    # temporaries + the fused accumulator block), all in multiples of 1024 lanes.
    in_bytes_per_lane = C * pred_isz + lab_isz
    vmem_per_lane = 2 * in_bytes_per_lane + 8 * 4          # ~8 live f32 planes margin
    acc_block_bytes = 2 * C * 3 * 8 * 128 * 4              # (double-buffered) accumulator
    budget = max(vmem_limit - acc_block_bytes - (4 << 20), 1 << 20)
    max_lanes_by_vmem = max(1024, (budget // vmem_per_lane) // 1024 * 1024)
    target_lanes = max(1024, (target_step_bytes // in_bytes_per_lane) // 1024 * 1024)

    per_slice = -(-L // split)                             # lanes per parallel slice
    per_slice_pad = -(-per_slice // 1024) * 1024
    tile_lanes = min(target_lanes, max_lanes_by_vmem, per_slice_pad)

    T = -(-per_slice // tile_lanes)                        # reduction steps per slice
    Lp = split * T * tile_lanes
    r_blk = tile_lanes // 128
    Rp = Lp // 128

    # Free reshapes only (no materializing transpose): flattened spatial -> lanes.
    pred3 = pred.reshape(N, C, L)
    lab2 = label.reshape(N, L)
    if Lp != L:
        pad = Lp - L
        pred3 = jnp.pad(pred3, ((0, 0), (0, 0), (0, pad)))
        # Pad labels with the out-of-range id C (never matches a real class).
        # Widen first if C does not fit the label dtype (avoid unsigned wraparound).
        if jnp.issubdtype(lab2.dtype, jnp.integer) and C > jnp.iinfo(lab2.dtype).max:
            lab2 = lab2.astype(jnp.int32)
        lab2 = jnp.pad(lab2, ((0, 0), (0, pad)), constant_values=C)

    pred4 = pred3.reshape(N, C, Rp, 128)
    lab3 = lab2.reshape(N, Rp, 128)

    grid = (split, N, T)

    acc = pl.pallas_call(
        functools.partial(_gdice_kernel, square=square, num_classes=C),
        out_shape=jax.ShapeDtypeStruct((split, N, C, 3, 8, 128), jnp.float32),
        grid_spec=pltpu.PrefetchScalarGridSpec(
            num_scalar_prefetch=0,
            grid=grid,
            in_specs=[
                pl.BlockSpec((pl.Squeezed(), C, r_blk, 128),
                             lambda s, n, i: (n, 0, s * T + i, 0)),
                pl.BlockSpec((pl.Squeezed(), r_blk, 128),
                             lambda s, n, i: (n, s * T + i, 0)),
            ],
            out_specs=pl.BlockSpec((1, 1, C, 3, 8, 128),
                                   lambda s, n, i: (s, n, 0, 0, 0, 0)),
        ),
        compiler_params=pltpu.CompilerParams(
            dimension_semantics=("parallel", "parallel", "arbitrary"),
            vmem_limit_bytes=int(vmem_limit),
        ),
    )(pred4, lab3)

    # Tiny finalize in plain JAX: reduce the (8,128) partials, apply class weights,
    # single scalar divide.
    totals = acc.sum(axis=(0, 1, 4, 5))                    # (C, 3)
    w = class_weight.astype(jnp.float32)
    anb = jnp.sum(w * totals[:, 0])
    aub = jnp.sum(w * (totals[:, 1] + totals[:, 2]))
    return 1.0 - 2.0 * anb / aub


def _reference_loss(pred, label, class_weight, square=False):
    """Pure-JAX reference mirroring the PyTorch dice_loss (batch_dice=True)."""
    C = pred.shape[1]
    onehot = jax.nn.one_hot(label, C, dtype=jnp.float32)          # (N, *spatial, C)
    onehot = jnp.moveaxis(onehot, -1, 1)                          # (N, C, *spatial)
    w = class_weight.reshape((C,) + (1,) * (pred.ndim - 2)).astype(jnp.float32)
    p = pred.astype(jnp.float32)
    anb = (w * p * onehot).sum()
    if square:
        aub = (w * (p ** 2 + onehot ** 2)).sum()
    else:
        aub = (w * (p + onehot)).sum()
    return 1.0 - 2.0 * anb / aub


# TODO(synk): batch_dice=False path of the reference (per-instance sums over dims
# (1..ndim-2)) is not implemented; GeneralizedDiceloss default is batch_dice=True.
# `smooth` is accepted by the reference but unused, so it is omitted.

if __name__ == "__main__":
    key = jax.random.PRNGKey(0)
    k1, k2, k3, k4 = jax.random.split(key, 4)

    # --- test 1: NCHW, N=2, C=4, defaults (square=False) ---
    N, C, H, W = 2, 4, 16, 16
    logits = jax.random.normal(k1, (N, C, H, W), dtype=jnp.float32)
    pred = jax.nn.softmax(logits, axis=1)                      # probability map, NCHW
    label = jax.random.randint(k2, (N, H, W), 0, C, dtype=jnp.int32)
    class_weight = (jnp.arange(C, dtype=jnp.float32) + 1.0) / C

    loss = jax.block_until_ready(generalized_dice_loss(pred, label, class_weight))
    ref = _reference_loss(pred, label, class_weight)
    assert jnp.allclose(loss, ref, rtol=1e-5, atol=1e-5), (loss, ref)

    # --- test 2: NCDHW, N=1 (exercises the split parallel axis + padding), square=True ---
    N2, C2, D2, H2, W2 = 1, 3, 4, 8, 8
    logits2 = jax.random.normal(k3, (N2, C2, D2, H2, W2), dtype=jnp.float32)
    pred2 = jax.nn.softmax(logits2, axis=1)
    label2 = jax.random.randint(k4, (N2, D2, H2, W2), 0, C2, dtype=jnp.int32)
    cw2 = jnp.ones((C2,), dtype=jnp.float32)

    loss2 = jax.block_until_ready(generalized_dice_loss(pred2, label2, cw2, square=True))
    ref2 = _reference_loss(pred2, label2, cw2, square=True)
    assert jnp.allclose(loss2, ref2, rtol=1e-5, atol=1e-5), (loss2, ref2)

    print("KERNEL_OK")
</pallas_src>

<mosaic_0001>
module attributes {stable_mosaic.version = 11 : i64} {
  func.func @_gdice_kernel(%arg0: i32, %arg1: i32, %arg2: i32, %arg3: memref<1x4x8x128xf32, #tpu.memory_space<vmem>>, %arg4: memref<1x8x128xi32, #tpu.memory_space<vmem>>, %arg5: memref<1x1x4x3x8x128xf32, #tpu.memory_space<vmem>>) attributes {dimension_semantics = [#tpu.dimension_semantics<parallel>, #tpu.dimension_semantics<parallel>, #tpu.dimension_semantics<arbitrary>], iteration_bounds = array<i64: 1, 2, 1>, scalar_prefetch = 0 : i64, scratch_operands = 0 : i64, tpu.core_type = #tpu.core_type<tc>, window_params = [{transform_indices = @transform_0, window_bounds = array<i64: 1, 4, 8, 128>}, {transform_indices = @transform_1, window_bounds = array<i64: 1, 8, 128>}, {transform_indices = @transform_2, window_bounds = array<i64: 1, 1, 4, 3, 8, 128>}]} {
    %c0_i32 = arith.constant 0 : i32
    %0 = arith.cmpi eq, %arg2, %c0_i32 : i32
    %1 = arith.extui %0 : i1 to i32
    %c0_i32_0 = arith.constant 0 : i32
    %2 = arith.cmpi ne, %1, %c0_i32_0 : i32
    scf.if %2 {
      %cst_176 = arith.constant 0.000000e+00 : f32
      %133 = vector.broadcast %cst_176 : f32 to vector<1x1x4x3x8x128xf32>
      %c0_177 = arith.constant 0 : index
      %c0_178 = arith.constant 0 : index
      %c0_179 = arith.constant 0 : index
      %c0_180 = arith.constant 0 : index
      %c0_181 = arith.constant 0 : index
      %c0_182 = arith.constant 0 : index
      %134 = vector.load %arg5[%c0_177, %c0_178, %c0_179, %c0_180, %c0_181, %c0_182] : memref<1x1x4x3x8x128xf32, #tpu.memory_space<vmem>>, vector<1x1x4x3x8x128xf32>
      tpu.vector_store %arg5[%c0_177, %c0_178, %c0_179, %c0_180, %c0_181, %c0_182], %133 {strides = array<i32>} : memref<1x1x4x3x8x128xf32, #tpu.memory_space<vmem>>, vector<1x1x4x3x8x128xf32>,
    } else {
    }
    %c0 = arith.constant 0 : index
    %c0_1 = arith.constant 0 : index
    %c0_2 = arith.constant 0 : index
    %3 = vector.load %arg4[%c0, %c0_1, %c0_2] : memref<1x8x128xi32, #tpu.memory_space<vmem>>, vector<1x8x128xi32>
    %4 = vector.shape_cast %3 : vector<1x8x128xi32> to vector<8x128xi32>
    %c0_3 = arith.constant 0 : index
    %c0_4 = arith.constant 0 : index
    %c0_5 = arith.constant 0 : index
    %c0_6 = arith.constant 0 : index
    %5 = vector.load %arg3[%c0_3, %c0_4, %c0_5, %c0_6] : memref<1x4x8x128xf32, #tpu.memory_space<vmem>>, vector<1x1x8x128xf32>
    %6 = vector.shape_cast %5 : vector<1x1x8x128xf32> to vector<8x128xf32>
    %c0_i32_7 = arith.constant 0 : i32
    %7 = vector.broadcast %c0_i32_7 : i32 to vector<8x128xi32>
    %8 = arith.cmpi eq, %4, %7 : vector<8x128xi32>
    %cst = arith.constant 0.000000e+00 : f32
    %9 = vector.broadcast %cst : f32 to vector<8x128xf32>
    %10 = arith.select %8, %6, %9 : vector<8x128xi1>, vector<8x128xf32>
    %11 = arith.extui %8 : vector<8x128xi1> to vector<8x128xi32>
    %12 = arith.sitofp %11 : vector<8x128xi32> to vector<8x128xf32>
    %13 = vector.shape_cast %10 : vector<8x128xf32> to vector<1x8x128xf32>
    %cst_8 = arith.constant dense<0.000000e+00> : vector<8x128xf32>
    %14 = vector.multi_reduction <add>, %13, %cst_8 [0] : vector<1x8x128xf32> to vector<8x128xf32>
    %15 = vector.shape_cast %6 : vector<8x128xf32> to vector<1x8x128xf32>
    %cst_9 = arith.constant dense<0.000000e+00> : vector<8x128xf32>
    %16 = vector.multi_reduction <add>, %15, %cst_9 [0] : vector<1x8x128xf32> to vector<8x128xf32>
    %17 = vector.shape_cast %12 : vector<8x128xf32> to vector<1x8x128xf32>
    %cst_10 = arith.constant dense<0.000000e+00> : vector<8x128xf32>
    %18 = vector.multi_reduction <add>, %17, %cst_10 [0] : vector<1x8x128xf32> to vector<8x128xf32>
    %c0_11 = arith.constant 0 : index
    %c0_12 = arith.constant 0 : index
    %c0_13 = arith.constant 0 : index
    %c0_14 = arith.constant 0 : index
    %c0_15 = arith.constant 0 : index
    %c0_16 = arith.constant 0 : index
    %19 = vector.load %arg5[%c0_11, %c0_12, %c0_13, %c0_14, %c0_15, %c0_16] : memref<1x1x4x3x8x128xf32, #tpu.memory_space<vmem>>, vector<1x1x1x1x8x128xf32>
    %20 = vector.shape_cast %19 : vector<1x1x1x1x8x128xf32> to vector<8x128xf32>
    %21 = arith.addf %20, %14 : vector<8x128xf32>
    %c0_17 = arith.constant 0 : index
    %c0_18 = arith.constant 0 : index
    %c0_19 = arith.constant 0 : index
    %c0_20 = arith.constant 0 : index
    %c0_21 = arith.constant 0 : index
    %c0_22 = arith.constant 0 : index
    %22 = vector.load %arg5[%c0_17, %c0_18, %c0_19, %c0_20, %c0_21, %c0_22] : memref<1x1x4x3x8x128xf32, #tpu.memory_space<vmem>>, vector<1x1x1x1x8x128xf32>
    %23 = vector.shape_cast %22 : vector<1x1x1x1x8x128xf32> to vector<8x128xf32>
    %24 = vector.shape_cast %21 : vector<8x128xf32> to vector<1x1x1x1x8x128xf32>
    tpu.vector_store %arg5[%c0_17, %c0_18, %c0_19, %c0_20, %c0_21, %c0_22], %24 {strides = array<i32>} : memref<1x1x4x3x8x128xf32, #tpu.memory_space<vmem>>, vector<1x1x1x1x8x128xf32>,
    %c0_23 = arith.constant 0 : index
    %c0_24 = arith.constant 0 : index
    %c0_25 = arith.constant 0 : index
    %c1 = arith.constant 1 : index
    %c0_26 = arith.constant 0 : index
    %c0_27 = arith.constant 0 : index
    %25 = vector.load %arg5[%c0_23, %c0_24, %c0_25, %c1, %c0_26, %c0_27] : memref<1x1x4x3x8x128xf32, #tpu.memory_space<vmem>>, vector<1x1x1x1x8x128xf32>
    %26 = vector.shape_cast %25 : vector<1x1x1x1x8x128xf32> to vector<8x128xf32>
    %27 = arith.addf %26, %16 : vector<8x128xf32>
    %c0_28 = arith.constant 0 : index
    %c0_29 = arith.constant 0 : index
    %c0_30 = arith.constant 0 : index
    %c1_31 = arith.constant 1 : index
    %c0_32 = arith.constant 0 : index
    %c0_33 = arith.constant 0 : index
    %28 = vector.load %arg5[%c0_28, %c0_29, %c0_30, %c1_31, %c0_32, %c0_33] : memref<1x1x4x3x8x128xf32, #tpu.memory_space<vmem>>, vector<1x1x1x1x8x128xf32>
    %29 = vector.shape_cast %28 : vector<1x1x1x1x8x128xf32> to vector<8x128xf32>
    %30 = vector.shape_cast %27 : vector<8x128xf32> to vector<1x1x1x1x8x128xf32>
    tpu.vector_store %arg5[%c0_28, %c0_29, %c0_30, %c1_31, %c0_32, %c0_33], %30 {strides = array<i32>} : memref<1x1x4x3x8x128xf32, #tpu.memory_space<vmem>>, vector<1x1x1x1x8x128xf32>,
    %c0_34 = arith.constant 0 : index
    %c0_35 = arith.constant 0 : index
    %c0_36 = arith.constant 0 : index
    %c2 = arith.constant 2 : index
    %c0_37 = arith.constant 0 : index
    %c0_38 = arith.constant 0 : index
    %31 = vector.load %arg5[%c0_34, %c0_35, %c0_36, %c2, %c0_37, %c0_38] : memref<1x1x4x3x8x128xf32, #tpu.memory_space<vmem>>, vector<1x1x1x1x8x128xf32>
    %32 = vector.shape_cast %31 : vector<1x1x1x1x8x128xf32> to vector<8x128xf32>
    %33 = arith.addf %32, %18 : vector<8x128xf32>
    %c0_39 = arith.constant 0 : index
    %c0_40 = arith.constant 0 : index
    %c0_41 = arith.constant 0 : index
    %c2_42 = arith.constant 2 : index
    %c0_43 = arith.constant 0 : index
    %c0_44 = arith.constant 0 : index
    %34 = vector.load %arg5[%c0_39, %c0_40, %c0_41, %c2_42, %c0_43, %c0_44] : memref<1x1x4x3x8x128xf32, #tpu.memory_space<vmem>>, vector<1x1x1x1x8x128xf32>
    %35 = vector.shape_cast %34 : vector<1x1x1x1x8x128xf32> to vector<8x128xf32>
    %36 = vector.shape_cast %33 : vector<8x128xf32> to vector<1x1x1x1x8x128xf32>
    tpu.vector_store %arg5[%c0_39, %c0_40, %c0_41, %c2_42, %c0_43, %c0_44], %36 {strides = array<i32>} : memref<1x1x4x3x8x128xf32, #tpu.memory_space<vmem>>, vector<1x1x1x1x8x128xf32>,
    %c0_45 = arith.constant 0 : index
    %c1_46 = arith.constant 1 : index
    %c0_47 = arith.constant 0 : index
    %c0_48 = arith.constant 0 : index
    %37 = vector.load %arg3[%c0_45, %c1_46, %c0_47, %c0_48] : memref<1x4x8x128xf32, #tpu.memory_space<vmem>>, vector<1x1x8x128xf32>
    %38 = vector.shape_cast %37 : vector<1x1x8x128xf32> to vector<8x128xf32>
    %c1_i32 = arith.constant 1 : i32
    %39 = vector.broadcast %c1_i32 : i32 to vector<8x128xi32>
    %40 = arith.cmpi eq, %4, %39 : vector<8x128xi32>
    %cst_49 = arith.constant 0.000000e+00 : f32
    %41 = vector.broadcast %cst_49 : f32 to vector<8x128xf32>
    %42 = arith.select %40, %38, %41 : vector<8x128xi1>, vector<8x128xf32>
    %43 = arith.extui %40 : vector<8x128xi1> to vector<8x128xi32>
    %44 = arith.sitofp %43 : vector<8x128xi32> to vector<8x128xf32>
    %45 = vector.shape_cast %42 : vector<8x128xf32> to vector<1x8x128xf32>
    %cst_50 = arith.constant dense<0.000000e+00> : vector<8x128xf32>
    %46 = vector.multi_reduction <add>, %45, %cst_50 [0] : vector<1x8x128xf32> to vector<8x128xf32>
    %47 = vector.shape_cast %38 : vector<8x128xf32> to vector<1x8x128xf32>
    %cst_51 = arith.constant dense<0.000000e+00> : vector<8x128xf32>
    %48 = vector.multi_reduction <add>, %47, %cst_51 [0] : vector<1x8x128xf32> to vector<8x128xf32>
    %49 = vector.shape_cast %44 : vector<8x128xf32> to vector<1x8x128xf32>
    %cst_52 = arith.constant dense<0.000000e+00> : vector<8x128xf32>
    %50 = vector.multi_reduction <add>, %49, %cst_52 [0] : vector<1x8x128xf32> to vector<8x128xf32>
    %c0_53 = arith.constant 0 : index
    %c0_54 = arith.constant 0 : index
    %c1_55 = arith.constant 1 : index
    %c0_56 = arith.constant 0 : index
    %c0_57 = arith.constant 0 : index
    %c0_58 = arith.constant 0 : index
    %51 = vector.load %arg5[%c0_53, %c0_54, %c1_55, %c0_56, %c0_57, %c0_58] : memref<1x1x4x3x8x128xf32, #tpu.memory_space<vmem>>, vector<1x1x1x1x8x128xf32>
    %52 = vector.shape_cast %51 : vector<1x1x1x1x8x128xf32> to vector<8x128xf32>
    %53 = arith.addf %52, %46 : vector<8x128xf32>
    %c0_59 = arith.constant 0 : index
    %c0_60 = arith.constant 0 : index
    %c1_61 = arith.constant 1 : index
    %c0_62 = arith.constant 0 : index
    %c0_63 = arith.constant 0 : index
    %c0_64 = arith.constant 0 : index
    %54 = vector.load %arg5[%c0_59, %c0_60, %c1_61, %c0_62, %c0_63, %c0_64] : memref<1x1x4x3x8x128xf32, #tpu.memory_space<vmem>>, vector<1x1x1x1x8x128xf32>
    %55 = vector.shape_cast %54 : vector<1x1x1x1x8x128xf32> to vector<8x128xf32>
    %56 = vector.shape_cast %53 : vector<8x128xf32> to vector<1x1x1x1x8x128xf32>
    tpu.vector_store %arg5[%c0_59, %c0_60, %c1_61, %c0_62, %c0_63, %c0_64], %56 {strides = array<i32>} : memref<1x1x4x3x8x128xf32, #tpu.memory_space<vmem>>, vector<1x1x1x1x8x128xf32>,
    %c0_65 = arith.constant 0 : index
    %c0_66 = arith.constant 0 : index
    %c1_67 = arith.constant 1 : index
    %c1_68 = arith.constant 1 : index
    %c0_69 = arith.constant 0 : index
    %c0_70 = arith.constant 0 : index
    %57 = vector.load %arg5[%c0_65, %c0_66, %c1_67, %c1_68, %c0_69, %c0_70] : memref<1x1x4x3x8x128xf32, #tpu.memory_space<vmem>>, vector<1x1x1x1x8x128xf32>
    %58 = vector.shape_cast %57 : vector<1x1x1x1x8x128xf32> to vector<8x128xf32>
    %59 = arith.addf %58, %48 : vector<8x128xf32>
    %c0_71 = arith.constant 0 : index
    %c0_72 = arith.constant 0 : index
    %c1_73 = arith.constant 1 : index
    %c1_74 = arith.constant 1 : index
    %c0_75 = arith.constant 0 : index
    %c0_76 = arith.constant 0 : index
    %60 = vector.load %arg5[%c0_71, %c0_72, %c1_73, %c1_74, %c0_75, %c0_76] : memref<1x1x4x3x8x128xf32, #tpu.memory_space<vmem>>, vector<1x1x1x1x8x128xf32>
    %61 = vector.shape_cast %60 : vector<1x1x1x1x8x128xf32> to vector<8x128xf32>
    %62 = vector.shape_cast %59 : vector<8x128xf32> to vector<1x1x1x1x8x128xf32>
    tpu.vector_store %arg5[%c0_71, %c0_72, %c1_73, %c1_74, %c0_75, %c0_76], %62 {strides = array<i32>} : memref<1x1x4x3x8x128xf32, #tpu.memory_space<vmem>>, vector<1x1x1x1x8x128xf32>,
    %c0_77 = arith.constant 0 : index
    %c0_78 = arith.constant 0 : index
    %c1_79 = arith.constant 1 : index
    %c2_80 = arith.constant 2 : index
    %c0_81 = arith.constant 0 : index
    %c0_82 = arith.constant 0 : index
    %63 = vector.load %arg5[%c0_77, %c0_78, %c1_79, %c2_80, %c0_81, %c0_82] : memref<1x1x4x3x8x128xf32, #tpu.memory_space<vmem>>, vector<1x1x1x1x8x128xf32>
    %64 = vector.shape_cast %63 : vector<1x1x1x1x8x128xf32> to vector<8x128xf32>
    %65 = arith.addf %64, %50 : vector<8x128xf32>
    %c0_83 = arith.constant 0 : index
    %c0_84 = arith.constant 0 : index
    %c1_85 = arith.constant 1 : index
    %c2_86 = arith.constant 2 : index
    %c0_87 = arith.constant 0 : index
    %c0_88 = arith.constant 0 : index
    %66 = vector.load %arg5[%c0_83, %c0_84, %c1_85, %c2_86, %c0_87, %c0_88] : memref<1x1x4x3x8x128xf32, #tpu.memory_space<vmem>>, vector<1x1x1x1x8x128xf32>
    %67 = vector.shape_cast %66 : vector<1x1x1x1x8x128xf32> to vector<8x128xf32>
    %68 = vector.shape_cast %65 : vector<8x128xf32> to vector<1x1x1x1x8x128xf32>
    tpu.vector_store %arg5[%c0_83, %c0_84, %c1_85, %c2_86, %c0_87, %c0_88], %68 {strides = array<i32>} : memref<1x1x4x3x8x128xf32, #tpu.memory_space<vmem>>, vector<1x1x1x1x8x128xf32>,
    %c0_89 = arith.constant 0 : index
    %c2_90 = arith.constant 2 : index
    %c0_91 = arith.constant 0 : index
    %c0_92 = arith.constant 0 : index
    %69 = vector.load %arg3[%c0_89, %c2_90, %c0_91, %c0_92] : memref<1x4x8x128xf32, #tpu.memory_space<vmem>>, vector<1x1x8x128xf32>
    %70 = vector.shape_cast %69 : vector<1x1x8x128xf32> to vector<8x128xf32>
    %c2_i32 = arith.constant 2 : i32
    %71 = vector.broadcast %c2_i32 : i32 to vector<8x128xi32>
    %72 = arith.cmpi eq, %4, %71 : vector<8x128xi32>
    %cst_93 = arith.constant 0.000000e+00 : f32
    %73 = vector.broadcast %cst_93 : f32 to vector<8x128xf32>
    %74 = arith.select %72, %70, %73 : vector<8x128xi1>, vector<8x128xf32>
    %75 = arith.extui %72 : vector<8x128xi1> to vector<8x128xi32>
    %76 = arith.sitofp %75 : vector<8x128xi32> to vector<8x128xf32>
    %77 = vector.shape_cast %74 : vector<8x128xf32> to vector<1x8x128xf32>
    %cst_94 = arith.constant dense<0.000000e+00> : vector<8x128xf32>
    %78 = vector.multi_reduction <add>, %77, %cst_94 [0] : vector<1x8x128xf32> to vector<8x128xf32>
    %79 = vector.shape_cast %70 : vector<8x128xf32> to vector<1x8x128xf32>
    %cst_95 = arith.constant dense<0.000000e+00> : vector<8x128xf32>
    %80 = vector.multi_reduction <add>, %79, %cst_95 [0] : vector<1x8x128xf32> to vector<8x128xf32>
    %81 = vector.shape_cast %76 : vector<8x128xf32> to vector<1x8x128xf32>
    %cst_96 = arith.constant dense<0.000000e+00> : vector<8x128xf32>
    %82 = vector.multi_reduction <add>, %81, %cst_96 [0] : vector<1x8x128xf32> to vector<8x128xf32>
    %c0_97 = arith.constant 0 : index
    %c0_98 = arith.constant 0 : index
    %c2_99 = arith.constant 2 : index
    %c0_100 = arith.constant 0 : index
    %c0_101 = arith.constant 0 : index
    %c0_102 = arith.constant 0 : index
    %83 = vector.load %arg5[%c0_97, %c0_98, %c2_99, %c0_100, %c0_101, %c0_102] : memref<1x1x4x3x8x128xf32, #tpu.memory_space<vmem>>, vector<1x1x1x1x8x128xf32>
    %84 = vector.shape_cast %83 : vector<1x1x1x1x8x128xf32> to vector<8x128xf32>
    %85 = arith.addf %84, %78 : vector<8x128xf32>
    %c0_103 = arith.constant 0 : index
    %c0_104 = arith.constant 0 : index
    %c2_105 = arith.constant 2 : index
    %c0_106 = arith.constant 0 : index
    %c0_107 = arith.constant 0 : index
    %c0_108 = arith.constant 0 : index
    %86 = vector.load %arg5[%c0_103, %c0_104, %c2_105, %c0_106, %c0_107, %c0_108] : memref<1x1x4x3x8x128xf32, #tpu.memory_space<vmem>>, vector<1x1x1x1x8x128xf32>
    %87 = vector.shape_cast %86 : vector<1x1x1x1x8x128xf32> to vector<8x128xf32>
    %88 = vector.shape_cast %85 : vector<8x128xf32> to vector<1x1x1x1x8x128xf32>
    tpu.vector_store %arg5[%c0_103, %c0_104, %c2_105, %c0_106, %c0_107, %c0_108], %88 {strides = array<i32>} : memref<1x1x4x3x8x128xf32, #tpu.memory_space<vmem>>, vector<1x1x1x1x8x128xf32>,
    %c0_109 = arith.constant 0 : index
    %c0_110 = arith.constant 0 : index
    %c2_111 = arith.constant 2 : index
    %c1_112 = arith.constant 1 : index
    %c0_113 = arith.constant 0 : index
    %c0_114 = arith.constant 0 : index
    %89 = vector.load %arg5[%c0_109, %c0_110, %c2_111, %c1_112, %c0_113, %c0_114] : memref<1x1x4x3x8x128xf32, #tpu.memory_space<vmem>>, vector<1x1x1x1x8x128xf32>
    %90 = vector.shape_cast %89 : vector<1x1x1x1x8x128xf32> to vector<8x128xf32>
    %91 = arith.addf %90, %80 : vector<8x128xf32>
    %c0_115 = arith.constant 0 : index
    %c0_116 = arith.constant 0 : index
    %c2_117 = arith.constant 2 : index
    %c1_118 = arith.constant 1 : index
    %c0_119 = arith.constant 0 : index
    %c0_120 = arith.constant 0 : index
    %92 = vector.load %arg5[%c0_115, %c0_116, %c2_117, %c1_118, %c0_119, %c0_120] : memref<1x1x4x3x8x128xf32, #tpu.memory_space<vmem>>, vector<1x1x1x1x8x128xf32>
    %93 = vector.shape_cast %92 : vector<1x1x1x1x8x128xf32> to vector<8x128xf32>
    %94 = vector.shape_cast %91 : vector<8x128xf32> to vector<1x1x1x1x8x128xf32>
    tpu.vector_store %arg5[%c0_115, %c0_116, %c2_117, %c1_118, %c0_119, %c0_120], %94 {strides = array<i32>} : memref<1x1x4x3x8x128xf32, #tpu.memory_space<vmem>>, vector<1x1x1x1x8x128xf32>,
    %c0_121 = arith.constant 0 : index
    %c0_122 = arith.constant 0 : index
    %c2_123 = arith.constant 2 : index
    %c2_124 = arith.constant 2 : index
    %c0_125 = arith.constant 0 : index
    %c0_126 = arith.constant 0 : index
    %95 = vector.load %arg5[%c0_121, %c0_122, %c2_123, %c2_124, %c0_125, %c0_126] : memref<1x1x4x3x8x128xf32, #tpu.memory_space<vmem>>, vector<1x1x1x1x8x128xf32>
    %96 = vector.shape_cast %95 : vector<1x1x1x1x8x128xf32> to vector<8x128xf32>
    %97 = arith.addf %96, %82 : vector<8x128xf32>
    %c0_127 = arith.constant 0 : index
    %c0_128 = arith.constant 0 : index
    %c2_129 = arith.constant 2 : index
    %c2_130 = arith.constant 2 : index
    %c0_131 = arith.constant 0 : index
    %c0_132 = arith.constant 0 : index
    %98 = vector.load %arg5[%c0_127, %c0_128, %c2_129, %c2_130, %c0_131, %c0_132] : memref<1x1x4x3x8x128xf32, #tpu.memory_space<vmem>>, vector<1x1x1x1x8x128xf32>
    %99 = vector.shape_cast %98 : vector<1x1x1x1x8x128xf32> to vector<8x128xf32>
    %100 = vector.shape_cast %97 : vector<8x128xf32> to vector<1x1x1x1x8x128xf32>
    tpu.vector_store %arg5[%c0_127, %c0_128, %c2_129, %c2_130, %c0_131, %c0_132], %100 {strides = array<i32>} : memref<1x1x4x3x8x128xf32, #tpu.memory_space<vmem>>, vector<1x1x1x1x8x128xf32>,
    %c0_133 = arith.constant 0 : index
    %c3 = arith.constant 3 : index
    %c0_134 = arith.constant 0 : index
    %c0_135 = arith.constant 0 : index
    %101 = vector.load %arg3[%c0_133, %c3, %c0_134, %c0_135] : memref<1x4x8x128xf32, #tpu.memory_space<vmem>>, vector<1x1x8x128xf32>
    %102 = vector.shape_cast %101 : vector<1x1x8x128xf32> to vector<8x128xf32>
    %c3_i32 = arith.constant 3 : i32
    %103 = vector.broadcast %c3_i32 : i32 to vector<8x128xi32>
    %104 = arith.cmpi eq, %4, %103 : vector<8x128xi32>
    %cst_136 = arith.constant 0.000000e+00 : f32
    %105 = vector.broadcast %cst_136 : f32 to vector<8x128xf32>
    %106 = arith.select %104, %102, %105 : vector<8x128xi1>, vector<8x128xf32>
    %107 = arith.extui %104 : vector<8x128xi1> to vector<8x128xi32>
    %108 = arith.sitofp %107 : vector<8x128xi32> to vector<8x128xf32>
    %109 = vector.shape_cast %106 : vector<8x128xf32> to vector<1x8x128xf32>
    %cst_137 = arith.constant dense<0.000000e+00> : vector<8x128xf32>
    %110 = vector.multi_reduction <add>, %109, %cst_137 [0] : vector<1x8x128xf32> to vector<8x128xf32>
    %111 = vector.shape_cast %102 : vector<8x128xf32> to vector<1x8x128xf32>
    %cst_138 = arith.constant dense<0.000000e+00> : vector<8x128xf32>
    %112 = vector.multi_reduction <add>, %111, %cst_138 [0] : vector<1x8x128xf32> to vector<8x128xf32>
    %113 = vector.shape_cast %108 : vector<8x128xf32> to vector<1x8x128xf32>
    %cst_139 = arith.constant dense<0.000000e+00> : vector<8x128xf32>
    %114 = vector.multi_reduction <add>, %113, %cst_139 [0] : vector<1x8x128xf32> to vector<8x128xf32>
    %c0_140 = arith.constant 0 : index
    %c0_141 = arith.constant 0 : index
    %c3_142 = arith.constant 3 : index
    %c0_143 = arith.constant 0 : index
    %c0_144 = arith.constant 0 : index
    %c0_145 = arith.constant 0 : index
    %115 = vector.load %arg5[%c0_140, %c0_141, %c3_142, %c0_143, %c0_144, %c0_145] : memref<1x1x4x3x8x128xf32, #tpu.memory_space<vmem>>, vector<1x1x1x1x8x128xf32>
    %116 = vector.shape_cast %115 : vector<1x1x1x1x8x128xf32> to vector<8x128xf32>
    %117 = arith.addf %116, %110 : vector<8x128xf32>
    %c0_146 = arith.constant 0 : index
    %c0_147 = arith.constant 0 : index
    %c3_148 = arith.constant 3 : index
    %c0_149 = arith.constant 0 : index
    %c0_150 = arith.constant 0 : index
    %c0_151 = arith.constant 0 : index
    %118 = vector.load %arg5[%c0_146, %c0_147, %c3_148, %c0_149, %c0_150, %c0_151] : memref<1x1x4x3x8x128xf32, #tpu.memory_space<vmem>>, vector<1x1x1x1x8x128xf32>
    %119 = vector.shape_cast %118 : vector<1x1x1x1x8x128xf32> to vector<8x128xf32>
    %120 = vector.shape_cast %117 : vector<8x128xf32> to vector<1x1x1x1x8x128xf32>
    tpu.vector_store %arg5[%c0_146, %c0_147, %c3_148, %c0_149, %c0_150, %c0_151], %120 {strides = array<i32>} : memref<1x1x4x3x8x128xf32, #tpu.memory_space<vmem>>, vector<1x1x1x1x8x128xf32>,
    %c0_152 = arith.constant 0 : index
    %c0_153 = arith.constant 0 : index
    %c3_154 = arith.constant 3 : index
    %c1_155 = arith.constant 1 : index
    %c0_156 = arith.constant 0 : index
    %c0_157 = arith.constant 0 : index
    %121 = vector.load %arg5[%c0_152, %c0_153, %c3_154, %c1_155, %c0_156, %c0_157] : memref<1x1x4x3x8x128xf32, #tpu.memory_space<vmem>>, vector<1x1x1x1x8x128xf32>
    %122 = vector.shape_cast %121 : vector<1x1x1x1x8x128xf32> to vector<8x128xf32>
    %123 = arith.addf %122, %112 : vector<8x128xf32>
    %c0_158 = arith.constant 0 : index
    %c0_159 = arith.constant 0 : index
    %c3_160 = arith.constant 3 : index
    %c1_161 = arith.constant 1 : index
    %c0_162 = arith.constant 0 : index
    %c0_163 = arith.constant 0 : index
    %124 = vector.load %arg5[%c0_158, %c0_159, %c3_160, %c1_161, %c0_162, %c0_163] : memref<1x1x4x3x8x128xf32, #tpu.memory_space<vmem>>, vector<1x1x1x1x8x128xf32>
    %125 = vector.shape_cast %124 : vector<1x1x1x1x8x128xf32> to vector<8x128xf32>
    %126 = vector.shape_cast %123 : vector<8x128xf32> to vector<1x1x1x1x8x128xf32>
    tpu.vector_store %arg5[%c0_158, %c0_159, %c3_160, %c1_161, %c0_162, %c0_163], %126 {strides = array<i32>} : memref<1x1x4x3x8x128xf32, #tpu.memory_space<vmem>>, vector<1x1x1x1x8x128xf32>,
    %c0_164 = arith.constant 0 : index
    %c0_165 = arith.constant 0 : index
    %c3_166 = arith.constant 3 : index
    %c2_167 = arith.constant 2 : index
    %c0_168 = arith.constant 0 : index
    %c0_169 = arith.constant 0 : index
    %127 = vector.load %arg5[%c0_164, %c0_165, %c3_166, %c2_167, %c0_168, %c0_169] : memref<1x1x4x3x8x128xf32, #tpu.memory_space<vmem>>, vector<1x1x1x1x8x128xf32>
    %128 = vector.shape_cast %127 : vector<1x1x1x1x8x128xf32> to vector<8x128xf32>
    %129 = arith.addf %128, %114 : vector<8x128xf32>
    %c0_170 = arith.constant 0 : index
    %c0_171 = arith.constant 0 : index
    %c3_172 = arith.constant 3 : index
    %c2_173 = arith.constant 2 : index
    %c0_174 = arith.constant 0 : index
    %c0_175 = arith.constant 0 : index
    %130 = vector.load %arg5[%c0_170, %c0_171, %c3_172, %c2_173, %c0_174, %c0_175] : memref<1x1x4x3x8x128xf32, #tpu.memory_space<vmem>>, vector<1x1x1x1x8x128xf32>
    %131 = vector.shape_cast %130 : vector<1x1x1x1x8x128xf32> to vector<8x128xf32>
    %132 = vector.shape_cast %129 : vector<8x128xf32> to vector<1x1x1x1x8x128xf32>
    tpu.vector_store %arg5[%c0_170, %c0_171, %c3_172, %c2_173, %c0_174, %c0_175], %132 {strides = array<i32>} : memref<1x1x4x3x8x128xf32, #tpu.memory_space<vmem>>, vector<1x1x1x1x8x128xf32>,
    return
  }
  func.func @transform_0(%arg0: i32, %arg1: i32, %arg2: i32) -> (i32, i32, i32, i32) {
    %c1_i32 = arith.constant 1 : i32
    %0 = arith.muli %arg0, %c1_i32 : i32
    %1 = arith.addi %0, %arg2 : i32
    %c0_i32 = arith.constant 0 : i32
    %c0_i32_0 = arith.constant 0 : i32
    %c0_i32_1 = arith.constant 0 : i32
    return %arg1, %c0_i32, %1, %c0_i32_0 : i32, i32, i32, i32
  }
  func.func @transform_1(%arg0: i32, %arg1: i32, %arg2: i32) -> (i32, i32, i32) {
    %c1_i32 = arith.constant 1 : i32
    %0 = arith.muli %arg0, %c1_i32 : i32
    %1 = arith.addi %0, %arg2 : i32
    %c0_i32 = arith.constant 0 : i32
    %c0_i32_0 = arith.constant 0 : i32
    return %arg1, %1, %c0_i32 : i32, i32, i32
  }
  func.func @transform_2(%arg0: i32, %arg1: i32, %arg2: i32) -> (i32, i32, i32, i32, i32, i32) {
    %c0_i32 = arith.constant 0 : i32
    %c0_i32_0 = arith.constant 0 : i32
    %c0_i32_1 = arith.constant 0 : i32
    %c0_i32_2 = arith.constant 0 : i32
    %c0_i32_3 = arith.constant 0 : i32
    return %arg0, %arg1, %c0_i32, %c0_i32_0, %c0_i32_1, %c0_i32_2 : i32, i32, i32, i32, i32, i32
  }
}

</mosaic_0001>

<bundles_post_ra>
// kernel: tpu_custom_call.1
= control target key start
LH: loop header
LB: loop body
LE: loop exit
PB: predicated region body
PF: predicated region fallthrough
CT: control target
= control target key end

     0   :  { %7 = vsyncpa [#allocation3], 0  ;;  %s925_s0 = inlined_call_operand.hbm [shape: f32[2,4,8,128], index: 0, kind: input, shape index: {}]   ;;  %s926_s1 = inlined_call_operand.hbm [shape: s32[2,8,128], index: 1, kind: input, shape index: {}]   ;;  %s927_s2 = inlined_call_operand.hbm [shape: f32[1,2,4,3,8,128], index: 2, kind: output, shape index: {}]  }
   0x1   :  { %9 = vsyncpa [#allocation3 + $0x1], 0 }
   0x2   :  { %10 = vsyncpa [#allocation6], 0 }
   0x3   :  { %12 = vsyncpa [#allocation6 + $0x1], 0 }
   0x4   :  { %13 = vsyncpa [#allocation4], 0 }
   0x5   :  { %15 = vsyncpa [#allocation4 + $0x1], 0  ;;  %s748_s9 = smov 0   ;;  %s750_s10 = smov 0  }
   0x6   :  { %s752_s11 = smov 0   ;;  %s754_s12 = smov 0  }
   0x7   :  { %s756_s13 = smov 0   ;;  %s758_s14 = smov 0  }
   0x8 LB: > { %s464_s15 = sadd.s32 4294967295, %s723_s14   ;;  %s465_s16 = sadd.s32 4294967294, %s723_s14   ;;  %s723_s14 = sphi %s758_s14, %s21_s14   ;;  %s719_s13 = sphi %s756_s13, %s938_s13   ;;  %s715_s12 = sphi %s754_s12, %s937_s12   ;;  %s711_s11 = sphi %s752_s11, %s936_s11   ;;  %s707_s10 = sphi %s750_s10, %s935_s10   ;;  %s703_s9 = sphi %s748_s9, %s934_s9  }
   0x9   : > { %s36_s17 = sadd.s32 1, %s719_s13  ;;  %s51_s18 = sadd.s32 1, %s711_s11 }
   0xa   : > { %p38_p0 = scmp.ge.s32.totalorder %s36_s17, 2  ;;  %p58_p1 = scmp.ne.s32.totalorder %s711_s11, %s707_s10 }
   0xb   : > { %p59_p2 = scmp.eq.s32.totalorder %s723_s14, 0  ;;  %p64_p3 = scmp.ne.s32.totalorder %s707_s10, %s703_s9 }
   0xc   : > { %s940_s17 = smov (%p38_p0, %s36_s17), 0  ;;  %p65_p5 = scmp.eq.s32.totalorder %s464_s15, 0 }
   0xd   : > { %p789_p4 = por %p59_p2, %p58_p1  ;;  %s46_s20 = ssub.s32 %s719_s13, %s940_s17 }
   0xe   : > { %p120_p6 = scmp.eq.s32.totalorder %s464_s15, 1  ;;  %p49_p7 = scmp.eq.s32.totalorder %s46_s20, 0 }
   0xf   : > { %p795_p8 = por %p65_p5, %p64_p3  ;;  %p126_p10 = scmp.eq.s32.totalorder %s465_s16, 1 }
  0x10   : > { %p799_p9 = por %p120_p6, %p58_p1  ;;  %p467_p12 = scmp.ge.s32.totalorder %s723_s14, 2 }
  0x11   : > { %s804_s23 = scalar_select %p49_p7, %s711_s11, %s51_s18  }
  0x12   : > { %p806_p11 = por %p126_p10, %p64_p3  ;;  %p528_p13 = scmp.lt.s32.totalorder %s723_s14, 2 }
  0x13   : > { %s813_s25 = sand.u32 1, %s711_s11   ;;  %s508_s27 = sshll.u32 %s719_s13, 9 }
  0x14   : > { %s468_s26 = sshll.u32 %s813_s25, 5  ;;  %s158_s30 = scalar_lea.hbm %s925_s0, %s508_s27 }
  0x15   : > { %s150_s3 = scalar_lea.vmem [#allocation2], %s468_s26  ;;  %p822_p0 = pnand %p528_p13, %p789_p4 }
  0x16   : > { %s159_s4 = sshll.u32 %s150_s3, 4  ;;  %p473_p1 = scmp.ge.s32.totalorder %s723_s14, 1  ;;  %s160_s4 = int_to_ptr.vmem [resolvable:$true] %s159_s4 }
  0x17   : > { %s147_s6 = scalar_lea.sflag [#allocation3], %s813_s25  ;;  %p585_p2 = pneg %p822_p0 }
  0x18   : > { %s596_s7 = scalar_lea.vmem %s160_s4, 512  ;;  %s725_s8 = smov [#allocation2]  }
  0x19   : > { %p597_p3 = scmp.ne.s32.totalorder %s160_s4, %s596_s7  ;;  %s601_s15 = sshll.u32 %s725_s8, 4  ;;  %s602_s15 = int_to_ptr.vmem [resolvable:$false] %s601_s15 }
  0x1a   : > { %s603_s16 = scalar_lea.vmem %s602_s15, 1024  ;;  %p604_p4 = scmp.lt.s32.totalorder %s160_s4, %s602_s15 }
  0x1b   : > { %p599_p5 = pnand %p597_p3, %p585_p2  ;;  %p605_p7 = scmp.lt.s32.totalorder %s603_s16, %s596_s7 }
  0x1d   : > { %p600_p6 = pneg %p599_p5  ;;  %p606_p10 = por %p605_p7, %p604_p4 }
  0x1f   : > { %p607_p13 = pnand %p606_p10, %p600_p6 }
  0x21   : > { %610 = shalt.err (!%p607_p13)
}
  0x22   : > { %s726_s18 = smov 128   ;;  %s727_s19 = smov 8  }
  0x23   : > { %520 = dma.hbm_to_vmem [thread:$0]  (!%p822_p0), %s158_s30, 512, %s160_s4, %s147_s6, %s726_s18, %s726_s18, %s727_s19  }
  0x24   : > { %p187_p3 = scmp.lt.s32.totalorder %s723_s14, 3  ;;  %s471_s20 = sshll.u32 %s813_s25, 3 }
  0x25   : > { %s472_s26 = sshll.u32 %s719_s13, 7  ;;  %s173_s7 = scalar_lea.vmem [#allocation5], %s471_s20 }
  0x26   : > { %p840_p5 = pnand %p473_p1, %p187_p3  ;;  %s180_s3 = scalar_lea.hbm %s926_s1, %s472_s26 }
  0x27   : > { %s182_s8 = sshll.u32 %s173_s7, 4  ;;  %s170_s15 = scalar_lea.sflag [#allocation6], %s813_s25  ;;  %s183_s8 = int_to_ptr.vmem [resolvable:$true] %s182_s8 }
  0x28   : > { %s624_s16 = scalar_lea.vmem %s183_s8, 128  ;;  %s728_s30 = smov [#allocation5]  }
  0x29   : > { %p625_p6 = scmp.ne.s32.totalorder %s183_s8, %s624_s16  ;;  %s629_s4 = sshll.u32 %s728_s30, 4  ;;  %s630_s4 = int_to_ptr.vmem [resolvable:$false] %s629_s4 }
  0x2a   : > { %s631_s6 = scalar_lea.vmem %s630_s4, 256  ;;  %p632_p1 = scmp.lt.s32.totalorder %s183_s8, %s630_s4 }
  0x2b   : > { %p627_p4 = pnand %p625_p6, %p585_p2  ;;  %p633_p10 = scmp.lt.s32.totalorder %s631_s6, %s624_s16 }
  0x2d   : > { %p628_p7 = pneg %p627_p4  ;;  %p634_p13 = por %p633_p10, %p632_p1 }
  0x2f   : > { %p635_p3 = pnand %p634_p13, %p628_p7 }
  0x31   : > { %638 = shalt.err (!%p635_p3)
}
  0x32   : > { %523 = dma.hbm_to_vmem [thread:$0]  (!%p822_p0), %s180_s3, 128, %s183_s8, %s170_s15  }
  0x33   : > { %191 = sbr.rel (%p840_p5) target bundleno = 86 (0x56), region = 28  ;;  %s856_s25 = sand.u32 (!%p840_p5), 1, %s707_s10  }
  0x34   : > { %s474_s18 = sshll.u32 (!%p840_p5), %s856_s25, 5  ;;  %s194_s19 = scalar_lea.sflag (!%p840_p5), [#allocation3], %s856_s25 }
  0x35   : > { %s197_s20 = scalar_lea.vmem (!%p840_p5), [#allocation2], %s474_s18 }
  0x38   : > { %690 = dma.done.wait (%p795_p8), %s194_s19, 512  }
  0x39   : > { %692 = vsyncadd (%p795_p8), %s194_s19, 4294966784  ;;  %s475_s5 = sshll.u32 %s856_s25, 3  ;;  %s203_s26 = scalar_lea.sflag [#allocation6], %s856_s25 }
  0x3a   : > { %s206_s27 = scalar_lea.vmem [#allocation5], %s475_s5 }
  0x3b   : > { %694 = dma.done.wait (%p795_p8), %s203_s26, 128  }
  0x3c   : > { %696 = vsyncadd (%p795_p8), %s203_s26, 4294967168  ;;  %s509_s28 = smul.u32 96, %s856_s25  ;;  %v250_v0 = vld [vmem:[%s206_s27] sm:$0xff]  ;;  %v489_v3 = vld [vmem:[%s197_s20 + $0x10] sm:$0xff]  ;;  %v729_v6 = vmov 0.0   ;;  %s334_s15 = scalar_lea.sflag [#allocation4], %s856_s25 }
  0x3d   : > { %v251_v1 = vld [vmem:[%s197_s20] sm:$0xff]  ;;  %v481_v2 = vld [vmem:[%s197_s20 + $0x8] sm:$0xff]  ;;  %vm252_vm0 = vcmp.eq.s32.totalorder %v250_v0, 0  ;;  %vm272_vm1 = vcmp.eq.s32.totalorder %v250_v0, 1  ;;  %v497_v4 = vld [vmem:[%s197_s20 + $0x18] sm:$0xff]  ;;  %s510_s29 = smul.u32 1536, %s715_s12 }
  0x3e   : > { %v253_v5 = vsel %vm252_vm0, %v251_v1, 0.0  ;;  %v476_v7 = vsel %vm252_vm0, 1.0, %v729_v6  ;;  %v273_v8 = vsel %vm272_vm1, %v481_v2, 0.0  ;;  %v482_v9 = vsel %vm272_vm1, 1.0, %v729_v6  ;;  %s231_s3 = scalar_lea.vmem [#allocation7], %s509_s28  ;;  %s730_s30 = smov [#allocation7]  }
  0x3f   : > { %478 = vst [vmem:[%s231_s3 + $0x8] sm:$0xff] %v251_v1  ;;  %486 = vst [vmem:[%s231_s3 + $0x20] sm:$0xff] %v481_v2  ;;  %s349_s21 = sshll.u32 %s231_s3, 4  ;;  %vm293_vm2 = vcmp.eq.s32.totalorder %v250_v0, 2  ;;  %vm314_vm3 = vcmp.eq.s32.totalorder %v250_v0, 3  ;;  %s875_s8 = scalar_lea.hbm %s927_s2, %s510_s29  ;;  %s877_s21 = int_to_ptr.vmem [resolvable:$true] %s349_s21 }
  0x40   : > { %261 = vst [vmem:[%s231_s3] sm:$0xff] %v253_v5  ;;  %480 = vst [vmem:[%s231_s3 + $0x10] sm:$0xff] %v476_v7  ;;  %v294_v10 = vsel %vm293_vm2, %v489_v3, 0.0  ;;  %v490_v11 = vsel %vm293_vm2, 1.0, %v729_v6  ;;  %v315_v12 = vsel %vm314_vm3, %v497_v4, 0.0  ;;  %v498_v13 = vsel %vm314_vm3, 1.0, %v729_v6  ;;  %s639_s16 = scalar_lea.vmem %s877_s21, 1536 }
  0x41   : > { %484 = vst [vmem:[%s231_s3 + $0x18] sm:$0xff] %v273_v8  ;;  %488 = vst [vmem:[%s231_s3 + $0x28] sm:$0xff] %v482_v9  ;;  %p640_p8 = scmp.ne.s32.totalorder %s877_s21, %s639_s16  ;;  %s643_s4 = sshll.u32 %s730_s30, 4  ;;  %s644_s4 = int_to_ptr.vmem [resolvable:$false] %s643_s4 }
  0x42   : > { %494 = vst [vmem:[%s231_s3 + $0x38] sm:$0xff] %v489_v3  ;;  %502 = vst [vmem:[%s231_s3 + $0x50] sm:$0xff] %v497_v4  ;;  %s645_s6 = scalar_lea.vmem %s644_s4, 3072  ;;  %p646_p5 = scmp.lt.s32.totalorder %s877_s21, %s644_s4 }
  0x43   : > { %492 = vst [vmem:[%s231_s3 + $0x30] sm:$0xff] %v294_v10  ;;  %496 = vst [vmem:[%s231_s3 + $0x40] sm:$0xff] %v490_v11  ;;  %p641_p0 = pnand %p640_p8, %p799_p9  ;;  %p647_p6 = scmp.lt.s32.totalorder %s645_s6, %s639_s16 }
  0x44   : > { %500 = vst [vmem:[%s231_s3 + $0x48] sm:$0xff] %v315_v12  ;;  %504 = vst [vmem:[%s231_s3 + $0x58] sm:$0xff] %v498_v13 }
  0x45   : > { %p642_p2 = pneg %p641_p0  ;;  %p648_p4 = por %p647_p6, %p646_p5 }
  0x47   : > { %p649_p7 = pnand %p648_p4, %p642_p2 }
  0x49   : > { %652 = shalt.err (!%p649_p7)
}
  0x4a   : > { %s653_s18 = scalar_lea.hbm %s875_s8, 1536  ;;  %s657_s5 = scalar_lea.hbm %s927_s2, 3072 }
  0x4b   : > { %p654_p1 = scmp.ne.s32.totalorder %s875_s8, %s653_s18  ;;  %p658_p3 = scmp.lt.s32.totalorder %s875_s8, %s927_s2 }
  0x4c   : > { %p659_p8 = scmp.lt.s32.totalorder %s657_s5, %s653_s18 }
  0x4d   : > { %p655_p10 = pnand %p654_p1, %p799_p9 }
  0x4e   : > { %p660_p0 = por %p659_p8, %p658_p3 }
  0x4f   : > { %p656_p13 = pneg %p655_p10 }
  0x51   : > { %p661_p2 = pnand %p660_p0, %p656_p13 }
  0x53   : > { %664 = shalt.err (!%p661_p2)
}
  0x54   : > { %s731_s28 = smov 128   ;;  %s732_s29 = smov 8  }
  0x55   : > { %515 = dma.vmem_to_hbm [thread:$0]  (%p799_p9), %s877_s21, 1536, %s875_s8, %s334_s15, %s731_s28, %s731_s28, %s732_s29  }
  0x56 PF: > { %s364_s3 = sand.u32 1, %s703_s9   ;;  %p525_p5 = pnand %p467_p12, %p806_p11 }
  0x57   : > { %s365_s7 = scalar_lea.sflag [#allocation4], %s364_s3 }
  0x58   : > { %p526_p6 = pneg %p525_p5 }
  0x5a   : > { %698 = dma.done.wait (%p526_p6), %s365_s7, 1536  }
  0x5b   : > { %700 = vsyncadd (%p526_p6), %s365_s7, 4294965760  ;;  %s21_s14 = sadd.s32 1, %s723_s14   ;;  %s934_s9 = smov %s707_s10 }
  0x5c   : > { %p18_p4 = scmp.ge.s32.totalorder %s21_s14, 4   ;;  %s935_s10 = smov %s711_s11 }
  0x5d   : > { %s936_s11 = smov %s804_s23  ;;  %s937_s12 = smov %s719_s13 }
  0x5e   : > { %s938_s13 = smov %s940_s17  ;;  %20 = sbr.rel (!%p18_p4) target bundleno = 8 (0x8), region = 104 }
  0x63   :  { %370 = vsyncpa [#allocation3], 1 }
  0x64   :  { %372 = vsyncpa [#allocation3 + $0x1], 1 }
  0x65   :  { %373 = vsyncpa [#allocation6], 1 }
  0x66   :  { %375 = vsyncpa [#allocation6 + $0x1], 1 }
  0x67   :  { %376 = vsyncpa [#allocation4], 1 }
  0x68   :  { %378 = vsyncpa [#allocation4 + $0x1], 1 }

</bundles_post_ra>
